<compile_context>
chip_gen: v7x
topology: tpu7x:2x2x1
jax: 0.10.0
libtpu: 0.0.40
codegen_flags: <defaults>
</compile_context>

<pallas_src>
import jax
import jax.numpy as jnp
from jax.experimental import pallas as pl
from jax.experimental.pallas import tpu as pltpu

# Per-step tile budget: in+out, double-buffered, must fit comfortably inside
# the default scoped VMEM on all generations (incl. v7x's 32 MiB / 64 MiB).
_VMEM_BUDGET_BYTES = 8 * 1024 * 1024


def _hin_forward_aliased(x3, weight, bias, channels_i, eps):
    """Fast path: only the instance-norm channels are touched; x aliased to output."""
    N, C, HW = x3.shape
    itemsize = jnp.dtype(x3.dtype).itemsize

    # Channel-block size: multiple of 8 (sublane tile), divides channels_i,
    # and (in + out) * double-buffer fits the VMEM budget.
    cap = max(8, (_VMEM_BUDGET_BYTES // (4 * HW * itemsize)) // 8 * 8)
    cb = 8
    for d in range(8, channels_i + 1, 8):
        if channels_i % d == 0 and d <= cap:
            cb = d
    num_cblk = channels_i // cb

    gamma = weight.astype(jnp.float32).reshape(channels_i, 1)
    beta = bias.astype(jnp.float32).reshape(channels_i, 1)

    def kernel(g_ref, b_ref, x_ref, o_ref):
        x = x_ref[0].astype(jnp.float32)                   # (cb, HW)
        mean = jnp.mean(x, axis=-1, keepdims=True)         # (cb, 1)
        d = x - mean
        var = jnp.mean(d * d, axis=-1, keepdims=True)      # biased, two-pass
        inv_std = jax.lax.rsqrt(var + eps)
        scale = inv_std * g_ref[...]                       # (cb, 1)
        shift = b_ref[...] - mean * scale
        o_ref[0] = (x * scale + shift).astype(o_ref.dtype)

    cost = pl.CostEstimate(
        flops=5 * N * channels_i * HW,
        transcendentals=N * channels_i,
        bytes_accessed=2 * N * channels_i * HW * itemsize)

    return pl.pallas_call(
        kernel,
        out_shape=jax.ShapeDtypeStruct((N, C, HW), x3.dtype),
        grid=(N, num_cblk),
        in_specs=[
            pl.BlockSpec((cb, 1), lambda n, c: (c, 0)),          # gamma
            pl.BlockSpec((cb, 1), lambda n, c: (c, 0)),          # beta
            pl.BlockSpec((1, cb, HW), lambda n, c: (n, c, 0)),   # x (norm half)
        ],
        out_specs=pl.BlockSpec((1, cb, HW), lambda n, c: (n, c, 0)),
        input_output_aliases={2: 0},   # pass-through channels keep x's values
        compiler_params=pltpu.CompilerParams(
            dimension_semantics=("parallel", "parallel")),
        cost_estimate=cost,
    )(gamma, beta, x3)


def _hin_forward_full(x3, weight, bias, channels_i, eps):
    """Fallback: block covers all C channels; pass-through gets identity scale/shift."""
    # TODO(synk): for very large C*H*W with odd channel counts this single-block
    # fallback could exceed VMEM; real HINet widths take the aliased fast path.
    N, C, HW = x3.shape
    itemsize = jnp.dtype(x3.dtype).itemsize

    gamma = jnp.concatenate(
        [weight.astype(jnp.float32),
         jnp.ones((C - channels_i,), jnp.float32)]).reshape(C, 1)
    beta = jnp.concatenate(
        [bias.astype(jnp.float32),
         jnp.zeros((C - channels_i,), jnp.float32)]).reshape(C, 1)

    def kernel(g_ref, b_ref, x_ref, o_ref):
        x = x_ref[0].astype(jnp.float32)                   # (C, HW)
        mean = jnp.mean(x, axis=-1, keepdims=True)
        d = x - mean
        var = jnp.mean(d * d, axis=-1, keepdims=True)
        inv_std = jax.lax.rsqrt(var + eps)
        cidx = jax.lax.broadcasted_iota(jnp.int32, (C, 1), 0)
        is_norm = cidx < channels_i
        scale_n = inv_std * g_ref[...]
        scale = jnp.where(is_norm, scale_n, 1.0)           # exact identity for x_r
        shift = jnp.where(is_norm, b_ref[...] - mean * scale_n, 0.0)
        o_ref[0] = (x * scale + shift).astype(o_ref.dtype)

    cost = pl.CostEstimate(
        flops=7 * N * C * HW,
        transcendentals=N * C,
        bytes_accessed=2 * N * C * HW * itemsize)

    return pl.pallas_call(
        kernel,
        out_shape=jax.ShapeDtypeStruct((N, C, HW), x3.dtype),
        grid=(N,),
        in_specs=[
            pl.BlockSpec((C, 1), lambda n: (0, 0)),
            pl.BlockSpec((C, 1), lambda n: (0, 0)),
            pl.BlockSpec((1, C, HW), lambda n: (n, 0, 0)),
        ],
        out_specs=pl.BlockSpec((1, C, HW), lambda n: (n, 0, 0)),
        compiler_params=pltpu.CompilerParams(
            dimension_semantics=("parallel",)),
        cost_estimate=cost,
    )(gamma, beta, x3)


def hinet_forward(x, weight, bias, eps=1e-5):
    """HINet forward: affine InstanceNorm over first C - C//2 channels, rest pass-through."""
    N, C, H, W = x.shape
    channels_i = C - C // 2
    assert weight.shape == (channels_i,) and bias.shape == (channels_i,)
    x3 = x.reshape(N, C, H * W)          # lane-dense last dim
    if channels_i % 8 == 0:
        out3 = _hin_forward_aliased(x3, weight, bias, channels_i, eps)
    else:
        out3 = _hin_forward_full(x3, weight, bias, channels_i, eps)
    return out3.reshape(N, C, H, W)


def hinet_reference(x, weight, bias, channels_i, eps=1e-5):
    x_i = x[:, :channels_i].astype(jnp.float32)
    x_r = x[:, channels_i:]
    mean = jnp.mean(x_i, axis=(2, 3), keepdims=True)
    var = jnp.mean((x_i - mean) ** 2, axis=(2, 3), keepdims=True)
    xn = (x_i - mean) * jax.lax.rsqrt(var + eps)
    xn = xn * weight[None, :, None, None] + bias[None, :, None, None]
    return jnp.concatenate([xn.astype(x.dtype), x_r], axis=1)


if __name__ == "__main__":
    key = jax.random.PRNGKey(0)
    # Case 1 exercises the aliased, channel-restricted fast path
    # (channels_i = 16, multiple of 8); case 2 exercises the full-channel
    # fallback (channels_i = 2).
    for (N, C, H, W) in [(2, 32, 16, 16), (2, 4, 16, 16)]:
        channels_i = C - C // 2
        kx, kw, kb, key = jax.random.split(key, 4)
        x = jax.random.normal(kx, (N, C, H, W), dtype=jnp.float32)
        weight = jax.random.normal(kw, (channels_i,), dtype=jnp.float32)
        bias = jax.random.normal(kb, (channels_i,), dtype=jnp.float32)

        out = jax.block_until_ready(hinet_forward(x, weight, bias))
        ref = hinet_reference(x, weight, bias, channels_i)

        assert out.shape == (N, C, H, W)
        err = float(jnp.max(jnp.abs(out - ref)))
        assert err < 1e-4, f"max abs error {err} for shape {(N, C, H, W)}"

    print("KERNEL_OK")
</pallas_src>

<mosaic_0001>
module attributes {stable_mosaic.version = 11 : i64} {
  func.func @kernel(%arg0: i32, %arg1: i32, %arg2: memref<16x1xf32, #tpu.memory_space<vmem>>, %arg3: memref<16x1xf32, #tpu.memory_space<vmem>>, %arg4: memref<1x16x256xf32, #tpu.memory_space<vmem>>, %arg5: memref<1x16x256xf32, #tpu.memory_space<vmem>>) attributes {dimension_semantics = [#tpu.dimension_semantics<parallel>, #tpu.dimension_semantics<parallel>], iteration_bounds = array<i64: 2, 1>, scalar_prefetch = 0 : i64, scratch_operands = 0 : i64, tpu.core_type = #tpu.core_type<tc>, window_params = [{transform_indices = @transform_0, window_bounds = array<i64: 16, 1>}, {transform_indices = @transform_1, window_bounds = array<i64: 16, 1>}, {transform_indices = @transform_2, window_bounds = array<i64: 1, 16, 256>}, {transform_indices = @transform_3, window_bounds = array<i64: 1, 16, 256>}]} {
    %c0 = arith.constant 0 : index
    %c0_0 = arith.constant 0 : index
    %c0_1 = arith.constant 0 : index
    %0 = vector.load %arg4[%c0, %c0_0, %c0_1] : memref<1x16x256xf32, #tpu.memory_space<vmem>>, vector<1x16x256xf32>
    %1 = vector.shape_cast %0 : vector<1x16x256xf32> to vector<16x256xf32>
    %cst = arith.constant dense<0.000000e+00> : vector<16xf32>
    %2 = vector.multi_reduction <add>, %1, %cst [1] : vector<16x256xf32> to vector<16xf32>
    %3 = vector.shape_cast %2 : vector<16xf32> to vector<16x1xf32>
    %cst_2 = arith.constant 2.560000e+02 : f32
    %4 = vector.broadcast %cst_2 : f32 to vector<16x1xf32>
    %5 = arith.divf %3, %4 : vector<16x1xf32>
    %6 = vector.broadcast %5 : vector<16x1xf32> to vector<16x256xf32>
    %7 = arith.subf %1, %6 : vector<16x256xf32>
    %8 = arith.mulf %7, %7 : vector<16x256xf32>
    %cst_3 = arith.constant dense<0.000000e+00> : vector<16xf32>
    %9 = vector.multi_reduction <add>, %8, %cst_3 [1] : vector<16x256xf32> to vector<16xf32>
    %10 = vector.shape_cast %9 : vector<16xf32> to vector<16x1xf32>
    %cst_4 = arith.constant 2.560000e+02 : f32
    %11 = vector.broadcast %cst_4 : f32 to vector<16x1xf32>
    %12 = arith.divf %10, %11 : vector<16x1xf32>
    %cst_5 = arith.constant 9.99999974E-6 : f32
    %13 = vector.broadcast %cst_5 : f32 to vector<16x1xf32>
    %14 = arith.addf %12, %13 : vector<16x1xf32>
    %15 = math.rsqrt %14 : vector<16x1xf32>
    %c0_6 = arith.constant 0 : index
    %c0_7 = arith.constant 0 : index
    %16 = vector.load %arg2[%c0_6, %c0_7] : memref<16x1xf32, #tpu.memory_space<vmem>>, vector<16x1xf32>
    %17 = arith.mulf %15, %16 : vector<16x1xf32>
    %c0_8 = arith.constant 0 : index
    %c0_9 = arith.constant 0 : index
    %18 = vector.load %arg3[%c0_8, %c0_9] : memref<16x1xf32, #tpu.memory_space<vmem>>, vector<16x1xf32>
    %19 = arith.mulf %5, %17 : vector<16x1xf32>
    %20 = arith.subf %18, %19 : vector<16x1xf32>
    %21 = vector.broadcast %17 : vector<16x1xf32> to vector<16x256xf32>
    %22 = arith.mulf %1, %21 : vector<16x256xf32>
    %23 = vector.broadcast %20 : vector<16x1xf32> to vector<16x256xf32>
    %24 = arith.addf %22, %23 : vector<16x256xf32>
    %c0_10 = arith.constant 0 : index
    %c0_11 = arith.constant 0 : index
    %c0_12 = arith.constant 0 : index
    %25 = vector.load %arg5[%c0_10, %c0_11, %c0_12] : memref<1x16x256xf32, #tpu.memory_space<vmem>>, vector<1x16x256xf32>
    %26 = vector.shape_cast %25 : vector<1x16x256xf32> to vector<16x256xf32>
    %27 = vector.shape_cast %24 : vector<16x256xf32> to vector<1x16x256xf32>
    tpu.vector_store %arg5[%c0_10, %c0_11, %c0_12], %27 {strides = array<i32>} : memref<1x16x256xf32, #tpu.memory_space<vmem>>, vector<1x16x256xf32>,
    return
  }
  func.func @transform_0(%arg0: i32, %arg1: i32) -> (i32, i32) {
    %c0_i32 = arith.constant 0 : i32
    %c0_i32_0 = arith.constant 0 : i32
    return %arg1, %c0_i32 : i32, i32
  }
  func.func @transform_1(%arg0: i32, %arg1: i32) -> (i32, i32) {
    %c0_i32 = arith.constant 0 : i32
    %c0_i32_0 = arith.constant 0 : i32
    return %arg1, %c0_i32 : i32, i32
  }
  func.func @transform_2(%arg0: i32, %arg1: i32) -> (i32, i32, i32) {
    %c0_i32 = arith.constant 0 : i32
    %c0_i32_0 = arith.constant 0 : i32
    return %arg0, %arg1, %c0_i32 : i32, i32, i32
  }
  func.func @transform_3(%arg0: i32, %arg1: i32) -> (i32, i32, i32) {
    %c0_i32 = arith.constant 0 : i32
    %c0_i32_0 = arith.constant 0 : i32
    return %arg0, %arg1, %c0_i32 : i32, i32, i32
  }
}

</mosaic_0001>

<bundles_post_ra>
// kernel: tpu_custom_call.1
= control target key start
LH: loop header
LB: loop body
LE: loop exit
PB: predicated region body
PF: predicated region fallthrough
CT: control target
= control target key end

     0   :  { %8 = vsyncpa [#allocation3], 0  ;;  %s887_s0 = inlined_call_operand.vmem [shape: f32[16,1], index: 0, kind: input, shape index: {}]   ;;  %s888_s1 = inlined_call_operand.vmem [shape: f32[16,1], index: 1, kind: input, shape index: {}]   ;;  %s889_s2 = inlined_call_operand.hbm [shape: f32[2,32,256], index: 2, kind: input, shape index: {}, may-alias: {2,3}]   ;;  %s890_s3 = inlined_call_operand.hbm [shape: f32[2,32,256], index: 3, kind: output, shape index: {}, may-alias: {2,3}]  }
   0x1   :  { %10 = vsyncpa [#allocation3 + $0x1], 0 }
   0x2   :  { %11 = vsyncpa [#allocation4], 0 }
   0x3   :  { %13 = vsyncpa [#allocation4 + $0x1], 0  ;;  %s696_s12 = smov 0   ;;  %s698_s13 = smov 0  }
   0x4   :  { %s700_s14 = smov 0   ;;  %s702_s15 = smov 0  }
   0x5   :  { %s704_s16 = smov 0   ;;  %s706_s17 = smov 0  }
   0x6 LB: > { %s463_s18 = sadd.s32 4294967295, %s667_s17   ;;  %s464_s19 = sadd.s32 4294967294, %s667_s17   ;;  %s667_s17 = sphi %s706_s17, %s19_s17   ;;  %s663_s16 = sphi %s704_s16, %s905_s16   ;;  %s659_s15 = sphi %s702_s15, %s904_s15   ;;  %s655_s14 = sphi %s700_s14, %s903_s14   ;;  %s651_s13 = sphi %s698_s13, %s902_s13   ;;  %s647_s12 = sphi %s696_s12, %s901_s12  }
   0x7   : > { %s31_s20 = sadd.s32 1, %s663_s16  ;;  %s92_s21 = sadd.s32 1, %s655_s14 }
   0x8   : > { %p33_p0 = scmp.ge.s32.totalorder %s31_s20, 2  ;;  %p99_p1 = scmp.ne.s32.totalorder %s655_s14, %s651_s13 }
   0x9   : > { %p100_p2 = scmp.eq.s32.totalorder %s667_s17, 0  ;;  %p105_p3 = scmp.ne.s32.totalorder %s651_s13, %s647_s12 }
   0xa   : > { %s907_s20 = smov (%p33_p0, %s31_s20), 0  ;;  %p106_p5 = scmp.eq.s32.totalorder %s463_s18, 0 }
   0xb   : > { %p737_p4 = por %p100_p2, %p99_p1  ;;  %s87_s23 = ssub.s32 %s663_s16, %s907_s20 }
   0xc   : > { %p131_p6 = scmp.eq.s32.totalorder %s463_s18, 1  ;;  %p90_p7 = scmp.eq.s32.totalorder %s87_s23, 0 }
   0xd   : > { %p743_p8 = por %p106_p5, %p105_p3  ;;  %p137_p10 = scmp.eq.s32.totalorder %s464_s19, 1 }
   0xe   : > { %p747_p9 = por %p131_p6, %p99_p1  ;;  %p494_p13 = scmp.lt.s32.totalorder %s667_s17, 2 }
   0xf   : > { %s752_s26 = scalar_select %p90_p7, %s655_s14, %s92_s21  }
  0x10   : > { %s894_s25 = scalar_select %p747_p9, 1, 0 }
  0x11   : > { %p754_p11 = por %p137_p10, %p105_p3  ;;  %s175_s28 = sand.u32 1, %s655_s14  }
  0x12   : > { %s469_s29 = sshll.u32 %s175_s28, 5  ;;  %s480_s30 = sshll.u32 %s663_s16, 10 }
  0x13   : > { %s895_s27 = scalar_select %p754_p11, 1, 0 }
  0x14   : > { %s765_s6 = scalar_lea.hbm %s889_s2, %s480_s30  ;;  %s179_s7 = scalar_lea.vmem [#allocation2], %s469_s29 }
  0x15   : > { %s189_s8 = sshll.u32 %s179_s7, 4  ;;  %p771_p0 = pnand %p494_p13, %p737_p4  ;;  %s767_s8 = int_to_ptr.vmem [resolvable:$true] %s189_s8 }
  0x16   : > { %s776_s10 = scalar_lea.sflag [#allocation3], %s175_s28  ;;  %s555_s11 = scalar_lea.hbm %s765_s6, 512 }
  0x17   : > { %p556_p2 = scmp.ne.s32.totalorder %s765_s6, %s555_s11  ;;  %p557_p3 = pneg %p771_p0 }
  0x18   : > { %s560_s21 = scalar_lea.hbm %s889_s2, 2048  ;;  %p561_p4 = scmp.lt.u32.totalorder %s765_s6, %s889_s2 }
  0x19   : > { %p558_p5 = pnand %p557_p3, %p556_p2  ;;  %p562_p7 = scmp.lt.u32.totalorder %s560_s21, %s555_s11 }
  0x1a   : > { %p564_p13 = scmp.lt.u32.totalorder %s555_s11, %s765_s6 }
  0x1b   : > { %p559_p6 = pneg %p558_p5  ;;  %p563_p10 = por %p562_p7, %p561_p4 }
  0x1d   : > { %p565_p12 = por %p564_p13, %p563_p10 }
  0x1f   : > { %p566_p1 = pnand %p565_p12, %p559_p6 }
  0x21   : > { %569 = shalt.err (!%p566_p1)
}
  0x22   : > { %s570_s28 = scalar_lea.vmem %s767_s8, 512  ;;  %s669_s29 = smov [#allocation2]  }
  0x23   : > { %p571_p2 = scmp.ne.s32.totalorder %s767_s8, %s570_s28  ;;  %s575_s30 = sshll.u32 %s669_s29, 4  ;;  %s576_s30 = int_to_ptr.vmem [resolvable:$false] %s575_s30 }
  0x24   : > { %s577_s4 = scalar_lea.vmem %s576_s30, 1024  ;;  %p578_p9 = scmp.lt.s32.totalorder %s767_s8, %s576_s30 }
  0x25   : > { %p573_p5 = pnand %p571_p2, %p557_p3  ;;  %p579_p4 = scmp.lt.s32.totalorder %s577_s4, %s570_s28 }
  0x27   : > { %p574_p11 = pneg %p573_p5  ;;  %p580_p7 = por %p579_p4, %p578_p9 }
  0x29   : > { %p581_p10 = pnand %p580_p7, %p574_p11 }
  0x2b   : > { %584 = shalt.err (!%p581_p10)
}
  0x2c   : > { %s670_s5 = smov 256   ;;  %s671_s7 = smov 16  }
  0x2d   : > { %489 = dma.hbm_to_vmem [thread:$0]  (!%p771_p0), %s765_s6, 512, %s767_s8, %s776_s10, %s670_s5, %s670_s5, %s671_s7  }
  0x2e   : > { %p197_p12 = scmp.lt.s32.totalorder %s667_s17, 3  ;;  %p897_p1 = scmp.ge.s32.totalorder %s667_s17, 1 }
  0x30   : > { %p198_p3 = pnand %p897_p1, %p197_p12 }
  0x31   : > { %s808_s11 = sand.u32 (!%p198_p3), 1, %s651_s13  }
  0x32   : > { %201 = sbr.rel (%p198_p3) target bundleno = 527 (0x20f), region = 32  ;;  %s473_s18 = sshll.u32 (!%p198_p3), %s808_s11, 5 }
  0x33   : > { %s204_s19 = scalar_lea.sflag (!%p198_p3), [#allocation3], %s808_s11  ;;  %s207_s21 = scalar_lea.vmem (!%p198_p3), [#allocation2], %s473_s18 }
  0x39   : > { %638 = dma.done.wait (%p743_p8), %s204_s19, 512  }
  0x3a   : > { %640 = vsyncadd (%p743_p8), %s204_s19, 4294966784  ;;  %v254_v0 = vld [vmem:[%s207_s21] sm:$0xff]  ;;  %v255_v1 = vld [vmem:[%s207_s21 + $0x8] sm:$0xff]  ;;  %v672_v20 = vmov 0   ;;  %s239_s29 = scalar_lea.vmem [#allocation5], %s473_s18  ;;  %s481_s4 = sshll.u32 %s659_s15, 10 }
  0x3b   : > { %v256_v2 = vld [vmem:[%s207_s21 + $0x10] sm:$0xff]  ;;  %v258_v3 = vadd.f32 %v255_v1, %v254_v0  ;;  %v257_v4 = vld [vmem:[%s207_s21 + $0x18] sm:$0xff]  ;;  %549 = vset.pattern.permute.xlu0 %v672_v20  ;;  %550 = vset.pattern.permute.xlu1 %v672_v20  ;;  %v287_v27 = vld [vmem:[%s887_s0] sm:$0xff]  ;;  %s346_s30 = sshll.u32 %s239_s29, 4  ;;  %s838_s18 = scalar_lea.hbm %s890_s3, %s481_s4  ;;  %s833_s30 = int_to_ptr.vmem [resolvable:$true] %s346_s30 }
  0x3c   : > { %v261_v5 = vadd.f32 %v257_v4, %v256_v2  ;;  %v288_v30 = vld [vmem:[%s887_s0 + $0x8] sm:$0xff]  ;;  %v291_v34 = vld [vmem:[%s888_s1] sm:$0xff]  ;;  %s330_s15 = scalar_lea.sflag [#allocation4], %s808_s11  ;;  %s585_s19 = scalar_lea.vmem %s833_s30, 512 }
  0x3d   : > { %259 = vadd.xlane.f32.xlu0 %v258_v3  ;;  %v292_v37 = vld [vmem:[%s888_s1 + $0x8] sm:$0xff]  ;;  %p586_p8 = scmp.ne.s32.totalorder %s833_s30, %s585_s19  ;;  %p898_p9 = scmp.ne.s32.totalorder %s894_s25, 0 }
  0x3e   : > { %s673_s21 = smov [#allocation5]  }
  0x3f   : > { %p587_p11 = pnand %p586_p8, %p898_p9  ;;  %s589_s24 = sshll.u32 %s673_s21, 4  ;;  %s590_s24 = int_to_ptr.vmem [resolvable:$false] %s589_s24 }
  0x40   : > { %s591_s6 = scalar_lea.vmem %s590_s24, 1024  ;;  %p592_p6 = scmp.lt.s32.totalorder %s833_s30, %s590_s24 }
  0x41   : > { %262 = vadd.xlane.f32.xlu0 %v261_v5  ;;  %p588_p0 = pneg %p587_p11  ;;  %p593_p13 = scmp.lt.s32.totalorder %s591_s6, %s585_s19 }
  0x43   : > { %p594_p2 = por %p593_p13, %p592_p6 }
  0x45   : > { %p595_p5 = pnand %p594_p2, %p588_p0 }
  0xca   : > { %v260_v6 = vpop.xlane.xlu0 %259 }
  0xcb   : > { %v265_v7 = vmul.f32 0.00390625, %v260_v6 }
  0xcd   : > { %v267_v8 = vsub.f32 %v254_v0, %v265_v7  ;;  %v268_v9 = vsub.f32 %v255_v1, %v265_v7 }
  0xce   : > { %v263_v10 = vpop.xlane.xlu0 %262 }
  0xcf   : > { %v266_v11 = vmul.f32 0.00390625, %v263_v10  ;;  %v271_v12 = vmul.f32 %v267_v8, %v267_v8  ;;  %v272_v13 = vmul.f32 %v268_v9, %v268_v9 }
  0xd1   : > { %v275_v14 = vadd.f32 %v272_v13, %v271_v12  ;;  %v269_v15 = vsub.f32 %v256_v2, %v266_v11  ;;  %v270_v16 = vsub.f32 %v257_v4, %v266_v11 }
  0xd3   : > { %276 = vadd.xlane.f32.xlu1 %v275_v14  ;;  %v273_v17 = vmul.f32 %v269_v15, %v269_v15  ;;  %v274_v18 = vmul.f32 %v270_v16, %v270_v16 }
  0xd5   : > { %v278_v19 = vadd.f32 %v274_v18, %v273_v17 }
  0xd7   : > { %279 = vadd.xlane.f32.xlu1 %v278_v19 }
 0x160   : > { %v277_v21 = vpop.xlane.xlu1 %276 }
 0x161   : > { %v281_v22 = vmul.f32 0.00390625, %v277_v21 }
 0x163   : > { %v283_v23 = vadd.f32 1e-05, %v281_v22 }
 0x164   : > { %v280_v24 = vpop.xlane.xlu1 %279 }
 0x165   : > { %551 = vrsqrt.f32 %v283_v23  ;;  %v282_v25 = vmul.f32 0.00390625, %v280_v24 }
 0x167   : > { %v284_v26 = vadd.f32 1e-05, %v282_v25 }
 0x169   : > { %553 = vrsqrt.f32 %v284_v26 }
 0x16f   : > { %v552_v28 = vpop.eup %551 }
 0x170   : > { %v289_v29 = vmul.f32 %v552_v28, %v287_v27 }
 0x172   : > { %299 = vperm.xlu0 %549, %v289_v29   ;;  %v293_v33 = vmul.f32 %v289_v29, %v265_v7 }
 0x173   : > { %v554_v31 = vpop.eup %553 }
 0x174   : > { %v290_v32 = vmul.f32 %v554_v31, %v288_v30  ;;  %v295_v35 = vsub.f32 %v291_v34, %v293_v33 }
 0x176   : > { %304 = vperm.xlu1 %550, %v290_v32   ;;  %v294_v36 = vmul.f32 %v290_v32, %v266_v11 }
 0x178   : > { %v296_v38 = vsub.f32 %v292_v37, %v294_v36 }
 0x17a   : > { %313 = vperm.xlu1 %550, %v295_v35  }
 0x17e   : > { %318 = vperm.xlu1 %550, %v296_v38  }
 0x1f1   : > { %v300_v39 = vpop.permute.xlu0 %299 }
 0x1f2   : > { %v307_v41 = vmul.f32 %v300_v39, %v254_v0  ;;  %v308_v42 = vmul.f32 %v300_v39, %v255_v1 }
 0x1f5   : > { %v305_v40 = vpop.permute.xlu1 %304 }
 0x1f6   : > { %v309_v46 = vmul.f32 %v305_v40, %v256_v2  ;;  %v310_v47 = vmul.f32 %v305_v40, %v257_v4 }
 0x1f9   : > { %v314_v43 = vpop.permute.xlu1 %313 }
 0x1fa   : > { %v321_v44 = vadd.f32 %v314_v43, %v307_v41  ;;  %v322_v45 = vadd.f32 %v314_v43, %v308_v42 }
 0x1fc   : > { %325 = vst [vmem:[%s239_s29] sm:$0xff] %v321_v44  ;;  %326 = vst [vmem:[%s239_s29 + $0x8] sm:$0xff] %v322_v45 }
 0x1fd   : > { %v319_v48 = vpop.permute.xlu1 %318 }
 0x1fe   : > { %v323_v49 = vadd.f32 %v319_v48, %v309_v46  ;;  %v324_v50 = vadd.f32 %v319_v48, %v310_v47 }
 0x200   : > { %327 = vst [vmem:[%s239_s29 + $0x10] sm:$0xff] %v323_v49  ;;  %328 = vst [vmem:[%s239_s29 + $0x18] sm:$0xff] %v324_v50 }
 0x201   : > { %598 = shalt.err (!%p595_p5)
}
 0x202   : > { %s599_s8 = scalar_lea.hbm %s838_s18, 512  ;;  %s603_s22 = scalar_lea.hbm %s890_s3, 2048 }
 0x203   : > { %p600_p4 = scmp.ne.s32.totalorder %s838_s18, %s599_s8  ;;  %p604_p12 = scmp.lt.u32.totalorder %s838_s18, %s890_s3 }
 0x204   : > { %p605_p1 = scmp.lt.u32.totalorder %s603_s22, %s599_s8  ;;  %p607_p8 = scmp.lt.u32.totalorder %s599_s8, %s838_s18 }
 0x205   : > { %p601_p7 = pnand %p600_p4, %p898_p9 }
 0x206   : > { %p606_p3 = por %p605_p1, %p604_p12 }
 0x207   : > { %p602_p10 = pneg %p601_p7 }
 0x208   : > { %p608_p11 = por %p607_p8, %p606_p3 }
 0x20a   : > { %p609_p0 = pnand %p608_p11, %p602_p10 }
 0x20c   : > { %612 = shalt.err (!%p609_p0)
}
 0x20d   : > { %s674_s29 = smov 256   ;;  %s675_s4 = smov 16  }
 0x20e   : > { %484 = dma.vmem_to_hbm [thread:$0]  (%p898_p9), %s833_s30, 512, %s838_s18, %s330_s15, %s674_s29, %s674_s29, %s675_s4  }
 0x20f PF: > { %s361_s5 = sand.u32 1, %s647_s12   ;;  %p899_p6 = scmp.ne.s32.totalorder %s895_s27, 0 }
 0x210   : > { %p900_p13 = scmp.ge.s32.totalorder %s667_s17, 2  ;;  %s362_s7 = scalar_lea.sflag [#allocation4], %s361_s5 }
 0x212   : > { %p491_p2 = pnand %p900_p13, %p899_p6 }
 0x214   : > { %642 = dma.done.wait (!%p491_p2), %s362_s7, 512  }
 0x215   : > { %644 = vsyncadd (!%p491_p2), %s362_s7, 4294966784  ;;  %s19_s17 = sadd.s32 1, %s667_s17   ;;  %s901_s12 = smov %s651_s13 }
 0x216   : > { %p16_p5 = scmp.ge.s32.totalorder %s19_s17, 4   ;;  %s902_s13 = smov %s655_s14 }
 0x217   : > { %s903_s14 = smov %s752_s26  ;;  %s904_s15 = smov %s663_s16 }
 0x218   : > { %s905_s16 = smov %s907_s20  ;;  %18 = sbr.rel (!%p16_p5) target bundleno = 6 (0x6), region = 83 }
 0x21f   :  { %367 = vsyncpa [#allocation3], 1 }
 0x220   :  { %369 = vsyncpa [#allocation3 + $0x1], 1 }
 0x221   :  { %370 = vsyncpa [#allocation4], 1 }
 0x222   :  { %372 = vsyncpa [#allocation4 + $0x1], 1 }

</bundles_post_ra>
